<compile_context>
chip_gen: v6e
topology: v6e:2x2x1
jax: 0.10.0
libtpu: 0.0.40
codegen_flags: <defaults>
</compile_context>

<pallas_src>
import functools

import jax
import jax.numpy as jnp
from jax import lax
from jax.experimental import pallas as pl
from jax.experimental.pallas import tpu as pltpu

LANE = 128


def _round_up(x, m):
    return ((x + m - 1) // m) * m


def _policy_kernel(x_ref, w1_ref, b1_ref, w2_ref, b2_ref, wh_ref, bh_ref,
                   out_ref, *, num_actions, log_std_min, log_std_max):
    # Activations are cast to bf16 only as MXU operands; accumulation and all
    # elementwise work (bias add, relu, clamp) stay in f32.
    x = x_ref[...].astype(jnp.bfloat16)

    # linear1 + relu
    h1 = jnp.dot(x, w1_ref[...], preferred_element_type=jnp.float32) + b1_ref[...]
    h1 = jnp.maximum(h1, 0.0)

    # linear2 + relu
    h2 = jnp.dot(h1.astype(jnp.bfloat16), w2_ref[...],
                 preferred_element_type=jnp.float32) + b2_ref[...]
    h2 = jnp.maximum(h2, 0.0)

    # Fused mean / log_std head: one matmul -> (TB, 2*num_actions).
    head = jnp.dot(h2.astype(jnp.bfloat16), wh_ref[...],
                   preferred_element_type=jnp.float32) + bh_ref[...]

    # Clamp only the log_std lanes (columns >= num_actions); mean lanes pass
    # through unchanged.  Lane-mask select avoids sub-width slicing/concat.
    col = lax.broadcasted_iota(jnp.int32, head.shape, 1)
    clamped = jnp.clip(head, log_std_min, log_std_max)
    out_ref[...] = jnp.where(col >= num_actions, clamped, head).astype(out_ref.dtype)


def pack_params(params):
    """Pad the hidden dim to a 128-lane multiple, fuse the two heads, and cast
    weights to bf16.  The feature (num_inputs) and action dims are NOT padded.
    Padded regions are zeros, so the math is unchanged."""
    w1, b1, w2, b2, wm, bm, ws, bs = params
    din, hidden = w1.shape
    num_actions = wm.shape[1]
    h_p = _round_up(hidden, LANE)

    w1p = jnp.zeros((din, h_p), jnp.bfloat16).at[:, :hidden].set(w1.astype(jnp.bfloat16))
    b1p = jnp.zeros((1, h_p), jnp.float32).at[:, :hidden].set(b1)
    w2p = jnp.zeros((h_p, h_p), jnp.bfloat16).at[:hidden, :hidden].set(w2.astype(jnp.bfloat16))
    b2p = jnp.zeros((1, h_p), jnp.float32).at[:, :hidden].set(b2)

    # Fused head: first num_actions lanes = mean head, next num_actions = log_std head.
    whp = jnp.zeros((h_p, 2 * num_actions), jnp.bfloat16)
    whp = whp.at[:hidden, :num_actions].set(wm.astype(jnp.bfloat16))
    whp = whp.at[:hidden, num_actions:].set(ws.astype(jnp.bfloat16))
    bhp = jnp.zeros((1, 2 * num_actions), jnp.float32)
    bhp = bhp.at[:, :num_actions].set(bm)
    bhp = bhp.at[:, num_actions:].set(bs)

    packed = (w1p, b1p, w2p, b2p, whp, bhp)
    dims = (din, hidden, num_actions, h_p)
    return packed, dims


def policy_forward(state, packed, dims, *, log_std_min=-20.0, log_std_max=2.0,
                   batch_tile=1024):
    """PolicyNetwork forward pass via a single batch-gridded Pallas kernel."""
    w1p, b1p, w2p, b2p, whp, bhp = packed
    din, hidden, num_actions, h_p = dims
    na2 = 2 * num_actions

    B = state.shape[0]
    B16 = _round_up(max(B, 1), 16)          # bf16 sublane packing
    if B16 >= 32:
        # At least 2 grid steps so "parallel" shards across v7x's 2 TensorCores;
        # cap tile size so very large batches pipeline.
        TB = _round_up(min(batch_tile, (B16 + 1) // 2), 16)
    else:
        TB = B16                             # tiny batch: one tile, one step
    B_pad = _round_up(B16, TB)

    if B_pad == B:
        xp = state                           # no wrapper copy needed
    else:
        # Padded copy stored directly in bf16 (the MXU operand dtype).
        xp = jnp.zeros((B_pad, din), jnp.bfloat16).at[:B].set(state.astype(jnp.bfloat16))

    kernel = functools.partial(_policy_kernel,
                               num_actions=num_actions,
                               log_std_min=float(log_std_min),
                               log_std_max=float(log_std_max))

    grid = (B_pad // TB,)
    fused = pl.pallas_call(
        kernel,
        out_shape=jax.ShapeDtypeStruct((B_pad, na2), jnp.float32),
        grid=grid,
        in_specs=[
            pl.BlockSpec((TB, din), lambda i: (i, 0)),      # state (blocked on batch)
            pl.BlockSpec((din, h_p), lambda i: (0, 0)),     # w1 (resident across steps)
            pl.BlockSpec((1, h_p), lambda i: (0, 0)),       # b1
            pl.BlockSpec((h_p, h_p), lambda i: (0, 0)),     # w2
            pl.BlockSpec((1, h_p), lambda i: (0, 0)),       # b2
            pl.BlockSpec((h_p, na2), lambda i: (0, 0)),     # fused head weight
            pl.BlockSpec((1, na2), lambda i: (0, 0)),       # fused head bias
        ],
        out_specs=pl.BlockSpec((TB, na2), lambda i: (i, 0)),
        compiler_params=pltpu.CompilerParams(
            dimension_semantics=("parallel",),              # batch axis: megacore-shardable
        ),
    )(xp, w1p, b1p, w2p, b2p, whp, bhp)

    mean = fused[:B, :num_actions]
    log_std = fused[:B, num_actions:]
    return mean, log_std


def init_params(key, num_inputs, num_actions, hidden_size, init_w=0.003):
    """Parameter init mirroring the PyTorch module; weights stored (in, out)."""
    ks = jax.random.split(key, 8)

    def lin(kw, kb, fan_in, fan_out, bound):
        w = jax.random.uniform(kw, (fan_in, fan_out), jnp.float32, -bound, bound)
        b = jax.random.uniform(kb, (1, fan_out), jnp.float32, -bound, bound)
        return w, b

    w1, b1 = lin(ks[0], ks[1], num_inputs, hidden_size, 1.0 / (num_inputs ** 0.5))
    w2, b2 = lin(ks[2], ks[3], hidden_size, hidden_size, 1.0 / (hidden_size ** 0.5))
    wm, bm = lin(ks[4], ks[5], hidden_size, num_actions, init_w)
    ws, bs = lin(ks[6], ks[7], hidden_size, num_actions, init_w)
    return (w1, b1, w2, b2, wm, bm, ws, bs)


def policy_forward_ref_f32(state, params, *, log_std_min=-20.0, log_std_max=2.0):
    """Pure-JAX f32 reference (exact PyTorch semantics)."""
    w1, b1, w2, b2, wm, bm, ws, bs = params
    h1 = jnp.maximum(state @ w1 + b1, 0.0)
    h2 = jnp.maximum(h1 @ w2 + b2, 0.0)
    mean = h2 @ wm + bm
    log_std = jnp.clip(h2 @ ws + bs, log_std_min, log_std_max)
    return mean, log_std


def policy_forward_ref_bf16(state, params, *, log_std_min=-20.0, log_std_max=2.0):
    """Pure-JAX reference mimicking the kernel's bf16-operand / f32-accum matmuls."""
    bf = jnp.bfloat16
    f32 = jnp.float32
    w1, b1, w2, b2, wm, bm, ws, bs = params
    h1 = jnp.maximum(
        jnp.dot(state.astype(bf), w1.astype(bf), preferred_element_type=f32) + b1, 0.0)
    h2 = jnp.maximum(
        jnp.dot(h1.astype(bf), w2.astype(bf), preferred_element_type=f32) + b2, 0.0)
    mean = jnp.dot(h2.astype(bf), wm.astype(bf), preferred_element_type=f32) + bm
    log_std = jnp.clip(
        jnp.dot(h2.astype(bf), ws.astype(bf), preferred_element_type=f32) + bs,
        log_std_min, log_std_max)
    return mean, log_std


if __name__ == "__main__":
    batch, num_inputs, num_actions, hidden = 8, 16, 4, 32

    key = jax.random.PRNGKey(0)
    k_state, k_params = jax.random.split(key)
    state = jax.random.normal(k_state, (batch, num_inputs), jnp.float32)
    params = init_params(k_params, num_inputs, num_actions, hidden)

    packed, dims = pack_params(params)
    mean, log_std = policy_forward(state, packed, dims)
    jax.block_until_ready((mean, log_std))

    assert mean.shape == (batch, num_actions)
    assert log_std.shape == (batch, num_actions)

    # Tight check vs. a reference with identical bf16-operand matmuls.
    mean_bf, log_std_bf = policy_forward_ref_bf16(state, params)
    assert jnp.allclose(mean, mean_bf, atol=1e-4, rtol=1e-4), "mean mismatch (bf16 ref)"
    assert jnp.allclose(log_std, log_std_bf, atol=1e-4, rtol=1e-4), "log_std mismatch (bf16 ref)"

    # Loose check vs. the exact f32 PyTorch-semantics reference (bf16 rounding only).
    mean_f, log_std_f = policy_forward_ref_f32(state, params)
    assert jnp.allclose(mean, mean_f, atol=1e-2, rtol=2e-2), "mean mismatch (f32 ref)"
    assert jnp.allclose(log_std, log_std_f, atol=1e-2, rtol=2e-2), "log_std mismatch (f32 ref)"

    print("KERNEL_OK")
</pallas_src>

<mosaic_0001>
module attributes {stable_mosaic.version = 11 : i64} {
  func.func @_policy_kernel(%arg0: i32, %arg1: memref<16x16xbf16, #tpu.memory_space<vmem>>, %arg2: memref<16x128xbf16, #tpu.memory_space<vmem>>, %arg3: memref<1x128xf32, #tpu.memory_space<vmem>>, %arg4: memref<128x128xbf16, #tpu.memory_space<vmem>>, %arg5: memref<1x128xf32, #tpu.memory_space<vmem>>, %arg6: memref<128x8xbf16, #tpu.memory_space<vmem>>, %arg7: memref<1x8xf32, #tpu.memory_space<vmem>>, %arg8: memref<16x8xf32, #tpu.memory_space<vmem>>) attributes {dimension_semantics = [#tpu.dimension_semantics<parallel>], iteration_bounds = array<i64: 1>, scalar_prefetch = 0 : i64, scratch_operands = 0 : i64, tpu.core_type = #tpu.core_type<tc>, window_params = [{transform_indices = @transform_0, window_bounds = array<i64: 16, 16>}, {pipeline_mode = #tpu.pipeline_mode<synchronous>, transform_indices = @transform_1, window_bounds = array<i64: 16, 128>}, {pipeline_mode = #tpu.pipeline_mode<synchronous>, transform_indices = @transform_2, window_bounds = array<i64: 1, 128>}, {pipeline_mode = #tpu.pipeline_mode<synchronous>, transform_indices = @transform_3, window_bounds = array<i64: 128, 128>}, {pipeline_mode = #tpu.pipeline_mode<synchronous>, transform_indices = @transform_4, window_bounds = array<i64: 1, 128>}, {pipeline_mode = #tpu.pipeline_mode<synchronous>, transform_indices = @transform_5, window_bounds = array<i64: 128, 8>}, {pipeline_mode = #tpu.pipeline_mode<synchronous>, transform_indices = @transform_6, window_bounds = array<i64: 1, 8>}, {transform_indices = @transform_7, window_bounds = array<i64: 16, 8>}]} {
    %c0 = arith.constant 0 : index
    %c0_0 = arith.constant 0 : index
    %0 = vector.load %arg1[%c0, %c0_0] : memref<16x16xbf16, #tpu.memory_space<vmem>>, vector<16x16xbf16>
    %c0_1 = arith.constant 0 : index
    %c0_2 = arith.constant 0 : index
    %1 = vector.load %arg2[%c0_1, %c0_2] : memref<16x128xbf16, #tpu.memory_space<vmem>>, vector<16x128xbf16>
    %cst = arith.constant dense<0.000000e+00> : vector<16x128xf32>
    %2 = tpu.matmul %0, %1, %cst {dimension_numbers = #tpu.dot_dimension_numbers<[1], [0], [0], [1], [0, 0, 1, 1], [], []>} : vector<16x16xbf16>, vector<16x128xbf16>, vector<16x128xf32> -> vector<16x128xf32>
    %c0_3 = arith.constant 0 : index
    %c0_4 = arith.constant 0 : index
    %3 = vector.load %arg3[%c0_3, %c0_4] : memref<1x128xf32, #tpu.memory_space<vmem>>, vector<1x128xf32>
    %4 = vector.broadcast %3 : vector<1x128xf32> to vector<16x128xf32>
    %5 = arith.addf %2, %4 : vector<16x128xf32>
    %cst_5 = arith.constant 0.000000e+00 : f32
    %6 = vector.broadcast %cst_5 : f32 to vector<16x128xf32>
    %7 = arith.maximumf %5, %6 : vector<16x128xf32>
    %8 = arith.truncf %7 : vector<16x128xf32> to vector<16x128xbf16>
    %c0_6 = arith.constant 0 : index
    %c0_7 = arith.constant 0 : index
    %9 = vector.load %arg4[%c0_6, %c0_7] : memref<128x128xbf16, #tpu.memory_space<vmem>>, vector<128x128xbf16>
    %cst_8 = arith.constant dense<0.000000e+00> : vector<16x128xf32>
    %10 = tpu.matmul %8, %9, %cst_8 {dimension_numbers = #tpu.dot_dimension_numbers<[1], [0], [0], [1], [0, 0, 1, 1], [], []>} : vector<16x128xbf16>, vector<128x128xbf16>, vector<16x128xf32> -> vector<16x128xf32>
    %c0_9 = arith.constant 0 : index
    %c0_10 = arith.constant 0 : index
    %11 = vector.load %arg5[%c0_9, %c0_10] : memref<1x128xf32, #tpu.memory_space<vmem>>, vector<1x128xf32>
    %12 = vector.broadcast %11 : vector<1x128xf32> to vector<16x128xf32>
    %13 = arith.addf %10, %12 : vector<16x128xf32>
    %cst_11 = arith.constant 0.000000e+00 : f32
    %14 = vector.broadcast %cst_11 : f32 to vector<16x128xf32>
    %15 = arith.maximumf %13, %14 : vector<16x128xf32>
    %16 = arith.truncf %15 : vector<16x128xf32> to vector<16x128xbf16>
    %c0_12 = arith.constant 0 : index
    %c0_13 = arith.constant 0 : index
    %17 = vector.load %arg6[%c0_12, %c0_13] : memref<128x8xbf16, #tpu.memory_space<vmem>>, vector<128x8xbf16>
    %cst_14 = arith.constant dense<0.000000e+00> : vector<16x8xf32>
    %18 = tpu.matmul %16, %17, %cst_14 {dimension_numbers = #tpu.dot_dimension_numbers<[1], [0], [0], [1], [0, 0, 1, 1], [], []>} : vector<16x128xbf16>, vector<128x8xbf16>, vector<16x8xf32> -> vector<16x8xf32>
    %c0_15 = arith.constant 0 : index
    %c0_16 = arith.constant 0 : index
    %19 = vector.load %arg7[%c0_15, %c0_16] : memref<1x8xf32, #tpu.memory_space<vmem>>, vector<1x8xf32>
    %20 = vector.broadcast %19 : vector<1x8xf32> to vector<16x8xf32>
    %21 = arith.addf %18, %20 : vector<16x8xf32>
    %22 = tpu.iota {dimensions = array<i32: 1>} : vector<16x8xi32>
    %cst_17 = arith.constant -2.000000e+01 : f32
    %cst_18 = arith.constant 2.000000e+00 : f32
    %23 = vector.broadcast %cst_17 : f32 to vector<16x8xf32>
    %24 = arith.maximumf %23, %21 : vector<16x8xf32>
    %25 = vector.broadcast %cst_18 : f32 to vector<16x8xf32>
    %26 = arith.minimumf %25, %24 : vector<16x8xf32>
    %c4_i32 = arith.constant 4 : i32
    %27 = vector.broadcast %c4_i32 : i32 to vector<16x8xi32>
    %28 = arith.cmpi sge, %22, %27 : vector<16x8xi32>
    %29 = arith.select %28, %26, %21 : vector<16x8xi1>, vector<16x8xf32>
    %c0_19 = arith.constant 0 : index
    %c0_20 = arith.constant 0 : index
    %30 = vector.load %arg8[%c0_19, %c0_20] : memref<16x8xf32, #tpu.memory_space<vmem>>, vector<16x8xf32>
    tpu.vector_store %arg8[%c0_19, %c0_20], %29 {strides = array<i32>} : memref<16x8xf32, #tpu.memory_space<vmem>>, vector<16x8xf32>,
    return
  }
  func.func @transform_0(%arg0: i32) -> (i32, i32) {
    %c0_i32 = arith.constant 0 : i32
    %c0_i32_0 = arith.constant 0 : i32
    return %arg0, %c0_i32 : i32, i32
  }
  func.func @transform_1(%arg0: i32) -> (i32, i32) {
    %c0_i32 = arith.constant 0 : i32
    %c0_i32_0 = arith.constant 0 : i32
    %c0_i32_1 = arith.constant 0 : i32
    return %c0_i32, %c0_i32_0 : i32, i32
  }
  func.func @transform_2(%arg0: i32) -> (i32, i32) {
    %c0_i32 = arith.constant 0 : i32
    %c0_i32_0 = arith.constant 0 : i32
    %c0_i32_1 = arith.constant 0 : i32
    return %c0_i32, %c0_i32_0 : i32, i32
  }
  func.func @transform_3(%arg0: i32) -> (i32, i32) {
    %c0_i32 = arith.constant 0 : i32
    %c0_i32_0 = arith.constant 0 : i32
    %c0_i32_1 = arith.constant 0 : i32
    return %c0_i32, %c0_i32_0 : i32, i32
  }
  func.func @transform_4(%arg0: i32) -> (i32, i32) {
    %c0_i32 = arith.constant 0 : i32
    %c0_i32_0 = arith.constant 0 : i32
    %c0_i32_1 = arith.constant 0 : i32
    return %c0_i32, %c0_i32_0 : i32, i32
  }
  func.func @transform_5(%arg0: i32) -> (i32, i32) {
    %c0_i32 = arith.constant 0 : i32
    %c0_i32_0 = arith.constant 0 : i32
    %c0_i32_1 = arith.constant 0 : i32
    return %c0_i32, %c0_i32_0 : i32, i32
  }
  func.func @transform_6(%arg0: i32) -> (i32, i32) {
    %c0_i32 = arith.constant 0 : i32
    %c0_i32_0 = arith.constant 0 : i32
    %c0_i32_1 = arith.constant 0 : i32
    return %c0_i32, %c0_i32_0 : i32, i32
  }
  func.func @transform_7(%arg0: i32) -> (i32, i32) {
    %c0_i32 = arith.constant 0 : i32
    %c0_i32_0 = arith.constant 0 : i32
    return %arg0, %c0_i32 : i32, i32
  }
}

</mosaic_0001>

<bundles_post_ra>
// kernel: tpu_custom_call.1
= control target key start
LH: loop header
LB: loop body
LE: loop exit
PB: predicated region body
PF: predicated region fallthrough
CT: control target
= control target key end

     0   :  { %12 = vsyncpa [#allocation3], 0  ;;  %s659_s0 = inlined_call_operand.vmem [shape: bf16[16,16], index: 0, kind: input, shape index: {}]   ;;  %s660_s1 = inlined_call_operand.hbm [shape: bf16[16,128], index: 1, kind: input, shape index: {}]   ;;  %s661_s2 = inlined_call_operand.vmem [shape: f32[1,128], index: 2, kind: input, shape index: {}]   ;;  %s662_s3 = inlined_call_operand.vmem [shape: bf16[128,128], index: 3, kind: input, shape index: {}]   ;;  %s663_s4 = inlined_call_operand.hbm [shape: f32[1,128], index: 4, kind: input, shape index: {}]   ;;  %s664_s5 = inlined_call_operand.vmem [shape: bf16[128,8], index: 5, kind: input, shape index: {}]   ;;  %s665_s6 = inlined_call_operand.vmem [shape: f32[1,8], index: 6, kind: input, shape index: {}]   ;;  %s666_s7 = inlined_call_operand.vmem [shape: f32[16,8], index: 7, kind: output, shape index: {}]  }
   0x1   :  { %13 = vsyncpa [#allocation5], 0  ;;  %s524_s24 = smov [#allocation2]  }
   0x2   :  { %s21_s25 = sshll.u32 %s524_s24, 4  ;;  %s22_s25 = int_to_ptr.vmem [resolvable:$true] %s21_s25 }
   0x3   :  { %s488_s26 = scalar_lea.vmem %s22_s25, 128  ;;  %p493_p1 = scmp.lt.s32.totalorder %s22_s25, %s22_s25 }
   0x4   :  { %p489_p0 = scmp.ne.s32.totalorder %s22_s25, %s488_s26  ;;  %p494_p2 = scmp.lt.s32.totalorder %s488_s26, %s488_s26 }
   0x6   :  { %p495_p3 = por %p494_p2, %p493_p1 }
   0x8   :  { %p496_p4 = pnand %p495_p3, %p489_p0 }
   0xa   :  { %499 = shalt.err (!%p496_p4)
}
   0xb   :  { %s525_s27 = smov 64   ;;  %s526_s28 = smov 4  }
   0xc   :  { %27 = dma.hbm_to_vmem [thread:$0]  %s660_s1, 128, %s22_s25, [#allocation3], %s525_s27, %s525_s27, %s526_s28  }
   0xd   :  { %s527_s8 = smov [#allocation4]  }
   0xe   :  { %s38_s9 = sshll.u32 %s527_s8, 4  ;;  %s39_s9 = int_to_ptr.vmem [resolvable:$true] %s38_s9 }
   0xf   :  { %s508_s10 = scalar_lea.vmem %s39_s9, 16  ;;  %s512_s11 = scalar_lea.vmem %s39_s9, 32 }
  0x10   :  { %p509_p5 = scmp.ne.s32.totalorder %s39_s9, %s508_s10  ;;  %p513_p6 = scmp.lt.s32.totalorder %s39_s9, %s39_s9 }
  0x11   :  { %p514_p7 = scmp.lt.s32.totalorder %s512_s11, %s508_s10 }
  0x13   :  { %p515_p8 = por %p514_p7, %p513_p6 }
  0x15   :  { %p516_p9 = pnand %p515_p8, %p509_p5 }
  0x17   :  { %519 = shalt.err (!%p516_p9)
}
  0x18   :  { %41 = dma.hbm_to_vmem [thread:$0]  %s663_s4, 16, %s39_s9, [#allocation5]  }
  0x19   :  { %520 = dma.done.wait [#allocation3], 128  }
  0x1a   :  { %521 = vsyncadd [#allocation3], 4294967168 }
  0x1b   :  { %522 = dma.done.wait [#allocation5], 16  }
  0x1c   :  { %523 = vsyncadd [#allocation5], 4294967280  ;;  %v528_v0 = vmov 0.0   ;;  %vm529_vm0 = vmmov 0   ;;  %v462_v1 = vld [vmem:[#allocation2] sm:$0xff]   ;;  %vm75_vm1 = vcmask 130048   ;;  %v350_v39 = vlaneseq }
  0x1d   :  { %410 = vmatprep.subr.bf16.mxu0 %v528_v0  ;;  %412 = vmatprep.mubr.msk.bf16.mxu0 %vm529_vm0, %v528_v0  ;;  %v463_v2 = vld [vmem:[%s659_s0] sm:$0xff]   ;;  %v464_v3 = vld [vmem:[%s662_s3 + $0x38] sm:$0xff]   ;;  %v465_v4 = vld [vmem:[%s662_s3 + $0x30] sm:$0xff]   ;;  %vm359_vm3 = vcmask 64512  }
  0x1e   :  { %416 = vmatprep.subr.bf16.mxu1 %v528_v0  ;;  %432 = vmatprep.mubr.msk.bf16.mxu1 %vm529_vm0, %v528_v0  ;;  %v466_v5 = vld [vmem:[%s662_s3 + $0x28] sm:$0xff]   ;;  %v467_v6 = vld [vmem:[%s662_s3 + $0x20] sm:$0xff]   ;;  %v468_v7 = vld [vmem:[%s662_s3 + $0x18] sm:$0xff]   ;;  %v351_v42 = vand.u32 127, %v350_v39 }
  0x1f   :  { %411 = vmatpush3.bf16.msra.mxu0 %v462_v1  ;;  %417 = vmatpush3.bf16.msra.mxu1 %v464_v3  ;;  %v469_v8 = vld [vmem:[%s662_s3 + $0x10] sm:$0xff]   ;;  %v470_v9 = vld [vmem:[%s662_s3 + $0x8] sm:$0xff]   ;;  %v471_v10 = vld [vmem:[%s662_s3] sm:$0xff]  }
  0x20   :  { %436 = vmatprep.subr.bf16.mxu0 %v528_v0  ;;  %418 = vmatprep.subr.bf16.mxu1 %v528_v0  ;;  %v472_v11 = vld [vmem:[%s664_s5 + $0x38] sm:$0xff]   ;;  %v473_v12 = vld [vmem:[%s664_s5 + $0x30] sm:$0xff]   ;;  %v474_v13 = vld [vmem:[%s664_s5 + $0x28] sm:$0xff]   ;;  %vm356_vm2 = vcmp.ge.s32.totalorder %v351_v42, 4 }
  0x21   :  { %v475_v14 = vld [vmem:[%s664_s5 + $0x20] sm:$0xff]   ;;  %v476_v15 = vld [vmem:[%s664_s5 + $0x18] sm:$0xff]   ;;  %v477_v26 = vld [vmem:[%s664_s5 + $0x10] sm:$0xff]  }
  0x22   :  { %413 = vmatmul.mubr.msk.bf16.vlgmr.msra.gmra.mxu0 %vm75_vm1, %v463_v2  ;;  %v368_v16 = vld [vmem:[%s661_s2] ss:$0 sm:$0xff]  ;;  %v478_v27 = vld [vmem:[%s664_s5 + $0x8] sm:$0xff]  }
  0x23   :  { %452 = vmatprep.mubr.msk.bf16.mxu0 %vm529_vm0, %v528_v0  ;;  %419 = vmatpush3.bf16.msra.mxu1 %v465_v4  ;;  %v479_v28 = vld [vmem:[%s664_s5] sm:$0xff]   ;;  %v372_v29 = vld [vmem:[#allocation4] ss:$0 sm:$0xff] }
  0x24   :  { %420 = vmatprep.subr.bf16.mxu1 %v528_v0  ;;  %437 = vmatpush3.bf16.msra.mxu0 %v472_v11  ;;  %v381_v40 = vld [vmem:[%s665_s6] ss:$0 sm:$0xff] }
  0x25   :  { %438 = vmatprep.subr.bf16.mxu0 %v528_v0 }
  0x27   :  { %421 = vmatpush3.bf16.msra.mxu1 %v466_v5 }
  0x28   :  { %422 = vmatprep.subr.bf16.mxu1 %v528_v0  ;;  %439 = vmatpush3.bf16.msra.mxu0 %v473_v12 }
  0x29   :  { %440 = vmatprep.subr.bf16.mxu0 %v528_v0 }
  0x2b   :  { %423 = vmatpush3.bf16.msra.mxu1 %v467_v6 }
  0x2c   :  { %424 = vmatprep.subr.bf16.mxu1 %v528_v0  ;;  %441 = vmatpush3.bf16.msra.mxu0 %v474_v13 }
  0x2d   :  { %442 = vmatprep.subr.bf16.mxu0 %v528_v0 }
  0x2f   :  { %425 = vmatpush3.bf16.msra.mxu1 %v468_v7 }
  0x30   :  { %426 = vmatprep.subr.bf16.mxu1 %v528_v0  ;;  %443 = vmatpush3.bf16.msra.mxu0 %v475_v14 }
  0x31   :  { %444 = vmatprep.subr.bf16.mxu0 %v528_v0 }
  0x33   :  { %427 = vmatpush3.bf16.msra.mxu1 %v469_v8 }
  0x34   :  { %428 = vmatprep.subr.bf16.mxu1 %v528_v0  ;;  %445 = vmatpush3.bf16.msra.mxu0 %v476_v15 }
  0x35   :  { %446 = vmatprep.subr.bf16.mxu0 %v528_v0 }
  0x37   :  { %429 = vmatpush3.bf16.msra.mxu1 %v470_v9 }
  0x38   :  { %430 = vmatprep.subr.bf16.mxu1 %v528_v0  ;;  %447 = vmatpush3.bf16.msra.mxu0 %v477_v26 }
  0x39   :  { %448 = vmatprep.subr.bf16.mxu0 %v528_v0 }
  0x3b   :  { %431 = vmatpush3.bf16.msra.mxu1 %v471_v10 }
  0x3c   :  { %449 = vmatpush3.bf16.msra.mxu0 %v478_v27 }
  0x3d   :  { %450 = vmatprep.subr.bf16.mxu0 %v528_v0 }
  0x40   :  { %451 = vmatpush3.bf16.msra.mxu0 %v479_v28 }
  0xe2   :  { %v113_v17 = vpop.f32.mrf.mxu0 }
  0xe3   :  { %v114_v19 = vadd.f32 %v368_v16, %v113_v17 }
  0xe4   :  { %v414_v18 = vpop.f32.mrf.mxu0 }
  0xe5   :  { %v120_v23 = vmax.f32 %v114_v19, 0.0 }
  0xe6   :  { %v116_v20 = vpop.f32.mrf.mxu0 }
  0xe7   :  { %v117_v21 = vadd.f32 %v368_v16, %v116_v20 }
  0xe8   :  { %v415_v22 = vpop.f32.mrf.mxu0 }
  0xe9   :  { %v121_v24 = vmax.f32 %v117_v21, 0.0 }
  0xeb   :  { %v122_v25 = vpack.c.bf16 %v121_v24, %v120_v23 }
  0xed   :  { %433 = vmatmul.mubr.bf16.vlgmr.msra.gmra.mxu1 %v122_v25 }
 0x1ad   :  { %v228_v30 = vpop.f32.mrf.mxu1 }
 0x1ae   :  { %v229_v32 = vadd.f32 %v372_v29, %v228_v30 }
 0x1af   :  { %v434_v31 = vpop.f32.mrf.mxu1 }
 0x1b0   :  { %v235_v36 = vmax.f32 %v229_v32, 0.0 }
 0x1b1   :  { %v231_v33 = vpop.f32.mrf.mxu1 }
 0x1b2   :  { %v232_v34 = vadd.f32 %v372_v29, %v231_v33 }
 0x1b3   :  { %v435_v35 = vpop.f32.mrf.mxu1 }
 0x1b4   :  { %v236_v37 = vmax.f32 %v232_v34, 0.0 }
 0x1b6   :  { %v237_v38 = vpack.c.bf16 %v236_v37, %v235_v36 }
 0x1b8   :  { %453 = vmatmul.mubr.bf16.vlgmr.msra.gmra.mxu0 %v237_v38 }
 0x278   :  { %v343_v41 = vpop.f32.mrf.mxu0 }
 0x279   :  { %v344_v43 = vadd.f32 %v381_v40, %v343_v41 }
 0x27a   :  { %v454_v44 = vpop.f32.mrf.mxu0 }
 0x27b   :  { %v352_v45 = vmax.f32 %v344_v43, -20.0 }
 0x27c   :  { %v346_v46 = vpop.f32.mrf.mxu0 }
 0x27d   :  { %v354_v47 = vmin.f32 %v352_v45, 2.0  ;;  %v347_v48 = vadd.f32 %v381_v40, %v346_v46 }
 0x27e   :  { %v455_v49 = vpop.f32.mrf.mxu0 }
 0x27f   :  { %v357_v50 = vsel %vm356_vm2, %v354_v47, %v344_v43  ;;  %v353_v51 = vmax.f32 %v347_v48, -20.0 }
 0x280   :  { %360 = vst.msk [vmem:[%s666_s7] sm:$0xff] %vm359_vm3, %v357_v50 }
 0x281   :  { %v355_v52 = vmin.f32 %v353_v51, 2.0 }
 0x283   :  { %v358_v53 = vsel %vm356_vm2, %v355_v52, %v347_v48 }
 0x284   :  { %361 = vst.msk [vmem:[%s666_s7 + $0x8] sm:$0xff] %vm359_vm3, %v358_v53 }
 0x285   :  { %366 = vsyncpa [#allocation3], 1 }
 0x286   :  { %367 = vsyncpa [#allocation5], 1 }

</bundles_post_ra>
